<compile_context>
chip_gen: v6e
topology: v6e:2x2x1
jax: 0.10.0
libtpu: 0.0.40
codegen_flags: <defaults>
</compile_context>

<pallas_src>
import math
from functools import partial

import jax
import jax.numpy as jnp
from jax import lax
from jax.experimental import pallas as pl
from jax.experimental.pallas import tpu as pltpu

_MiB = 1024 * 1024


def _cdiv(a, b):
    return -(-a // b)


def _round_up(x, m):
    return _cdiv(x, m) * m


def _tpu_vmem_capacity_bytes(default=64 * _MiB):
    """Per-core VMEM capacity; fall back to the smallest current part (v7x, 64 MiB)."""
    try:
        cap = int(pltpu.get_tpu_info().vmem_capacity_bytes)
        if cap > 0:
            return cap
    except Exception:
        pass
    return default


def _convch_kernel(*refs, kh, kw, W, fused, has_halo):
    # refs (has_halo=True):  xm, xt, xb, w, b, o
    # refs (has_halo=False): xm, w, b, o
    #   xm: (1, Cin, TH*W)    current row tile, (rows, W) flattened on the lanes
    #   xt: (1, Cin, HALO*W)  row block just above the tile (clamped at the top)
    #   xb: (1, Cin, HALO*W)  row block just below the tile (clamped at the bottom)
    #   w : fused  -> (Cout, (kh+kw)*Cin)  fused cross-hair weight matrix
    #       !fused -> (kh+kw, Cout, Cin)   per-tap weight matrices
    #   b : (Cout, 1) fp32    combined bias (b_v + b_h)
    #   o : (1, Cout, TH*W)   lane-dense output tile (flattened NCHW)
    if has_halo:
        xm_ref, xt_ref, xb_ref, w_ref, b_ref, o_ref = refs
    else:
        xm_ref, w_ref, b_ref, o_ref = refs

    ph = (kh - 1) // 2
    pw = (kw - 1) // 2
    P = xm_ref.shape[2]                    # TH * W
    Cout = o_ref.shape[1]
    mainf = xm_ref[0]                      # (Cin, P)

    # ---- vertical window: ph halo rows above + main tile + ph halo rows below ----
    if has_halo:
        i = pl.program_id(1)
        n_tiles = pl.num_programs(1)
        halo_lanes = xt_ref.shape[2]
        top = xt_ref[0, :, halo_lanes - ph * W:]      # last ph rows of block above
        bot = xb_ref[0, :, :ph * W]                   # first ph rows of block below
        # rows outside the image contribute zero ("same" zero padding)
        top = jnp.where(i == 0, jnp.zeros_like(top), top)
        bot = jnp.where(i == n_tiles - 1, jnp.zeros_like(bot), bot)
        winf = jnp.concatenate([top, mainf, bot], axis=1)   # (Cin, (TH+2ph)*W)
    else:
        winf = mainf

    # ---- hoisted horizontal-tap helpers (shared by every horizontal tap) ----
    if pw > 0:
        col = lax.broadcasted_iota(jnp.int32, (1, P), 1) % W
        zeros_m = jnp.zeros_like(mainf)

    def vtap(dk):                          # image rows r + dk - ph
        if ph == 0:
            return mainf
        return winf[:, dk * W: dk * W + P]

    def htap(dw):                          # image cols c + dw - pw
        t = dw - pw
        if t == 0:
            return mainf
        # circular lane shift (two static slices); the column mask kills both
        # the out-of-row columns and the wrap-around lanes.
        s = t % P
        shifted = jnp.concatenate([mainf[:, s:], mainf[:, :s]], axis=1)
        valid = jnp.logical_and(col + t >= 0, col + t < W)
        return jnp.where(valid, shifted, zeros_m)

    if fused:
        # small-Cin path: one fused MXU matmul per tile over the im2col stack
        pieces = [vtap(dk) for dk in range(kh)] + [htap(dw) for dw in range(kw)]
        xstack = jnp.concatenate(pieces, axis=0)             # (K, P)
        acc = jnp.dot(w_ref[...], xstack, preferred_element_type=jnp.float32)
    else:
        # large-Cin path: kh+kw accumulating dots, no (K, P) im2col copy traffic
        acc = jnp.zeros((Cout, P), jnp.float32)
        for dk in range(kh):
            acc = acc + jnp.dot(w_ref[dk], vtap(dk),
                                preferred_element_type=jnp.float32)
        for dw in range(kw):
            acc = acc + jnp.dot(w_ref[kh + dw], htap(dw),
                                preferred_element_type=jnp.float32)

    acc = acc + b_ref[...]                                   # (Cout, 1) broadcast
    o_ref[0] = acc.astype(o_ref.dtype)


def conv2d_ch(x_nchw, w_v, w_h, b_v, b_h, *, row_tile=None, fuse_taps=None,
              compute_dtype=None, out_dtype=None,
              vmem_budget_bytes=None, vmem_limit_bytes=None):
    """Cross-hair conv (Conv2dCH forward, PyTorch defaults).

    x_nchw: (N, Cin, H, W); w_v: (Cout, Cin, kh, 1); w_h: (Cout, Cin, 1, kw);
    b_v, b_h: (Cout,).  Returns (N, Cout, H, W).

    compute_dtype=jnp.bfloat16 selects the bf16 I/O path (bf16 inputs AND
    weights, fp32 MXU accumulate, fp32 bias) -- note the weights are then held
    in bf16, unlike a PyTorch module that keeps fp32 parameters.
    """
    # TODO(synk): stride != 1, groups != 1, padding > (k-1)//2 and non-'zeros'
    # padding modes of the PyTorch module are not implemented here (defaults only).
    N, Cin, H, W = x_nchw.shape
    Cout, _, kh, _ = w_v.shape
    kw = w_h.shape[-1]
    if kh % 2 == 0 or kw % 2 == 0:
        raise ValueError("even kernel sizes are not supported")
    ph, pw = (kh - 1) // 2, (kw - 1) // 2

    out_dtype = jnp.dtype(out_dtype) if out_dtype is not None else jnp.dtype(x_nchw.dtype)
    cdt = jnp.dtype(compute_dtype) if compute_dtype is not None else jnp.dtype(x_nchw.dtype)
    csize = cdt.itemsize
    osize = out_dtype.itemsize

    # Per-tap accumulate for large Cin; fused im2col matmul for small Cin
    # (per-tap dots are already MXU-efficient at Cin >= ~128 and avoid all
    # im2col copy traffic; on v7x the MRB accumulates them nearly for free).
    if fuse_taps is None:
        fuse_taps = Cin < 128

    # ---- weights / bias in the layout each kernel path expects ----
    if fuse_taps:
        # columns = [kh vertical taps, kw horizontal taps], Cin-contiguous per tap
        wv_flat = jnp.transpose(w_v[:, :, :, 0], (0, 2, 1)).reshape(Cout, kh * Cin)
        wh_flat = jnp.transpose(w_h[:, :, 0, :], (0, 2, 1)).reshape(Cout, kw * Cin)
        w_arr = jnp.concatenate([wv_flat, wh_flat], axis=1).astype(cdt)   # (Cout, K)
        w_spec = pl.BlockSpec(w_arr.shape, lambda n, i: (0, 0))
    else:
        wv_taps = jnp.transpose(w_v[:, :, :, 0], (2, 0, 1))               # (kh, Cout, Cin)
        wh_taps = jnp.transpose(w_h[:, :, 0, :], (2, 0, 1))               # (kw, Cout, Cin)
        w_arr = jnp.concatenate([wv_taps, wh_taps], axis=0).astype(cdt)   # (kh+kw, Cout, Cin)
        w_spec = pl.BlockSpec(w_arr.shape, lambda n, i: (0, 0, 0))
    bias = (b_v + b_h).reshape(Cout, 1).astype(jnp.float32)

    # ---- per-generation VMEM sizing ----
    vmem_cap = _tpu_vmem_capacity_bytes()
    if vmem_budget_bytes is None:
        # ~48 MiB tile budget on 128-MiB parts (v5e/v6e), ~24 MiB on 64-MiB v7x
        vmem_budget_bytes = min(max(vmem_cap * 3 // 8, 16 * _MiB), 64 * _MiB)
    if vmem_limit_bytes is None:
        # ~100 MiB limit on v5e/v6e, ~48 MiB on v7x
        vmem_limit_bytes = max(min(int(vmem_cap * 0.8), vmem_cap - 16 * _MiB),
                               32 * _MiB)

    # ---- row-tile selection ----
    # Lane axis forces TH*W % 128 == 0; with a vertical halo the tile must also
    # be a whole number of HALO-row blocks.  NOTE: when gcd(W, 128) is small the
    # lane-aligned halo over-fetches (W=56 -> 16 rows/side, W=7 -> 128 rows/side
    # at ph=1); a pl.Element halo of round_up(ph*W, 128) lanes would shrink it.
    lane_mult = 128 // math.gcd(W, 128)
    if ph > 0:
        HALO = lane_mult * _cdiv(ph, lane_mult)
        unit = HALO
    else:
        HALO = 0
        unit = lane_mult

    def est_vmem(th):
        p = th * W
        io = 2 * Cin * p * csize + 2 * Cout * p * osize     # double-buffered main I/O
        tmp = 2 * Cout * p * 4                              # fp32 acc / matmul result
        if ph > 0:
            io += 4 * Cin * HALO * W * csize                # two halo operands, 2 buffers
            tmp += Cin * (p + 2 * ph * W) * csize           # vertical window (winf)
        if fuse_taps:
            tmp += 2 * (kh + kw) * Cin * p * csize          # im2col stack + concat temp
        else:
            tmp += 2 * Cin * p * csize                      # per-tap shift temporaries
        wb = w_arr.size * csize + Cout * 4
        return int(1.2 * (io + tmp)) + wb                   # margin for Mosaic scratch

    max_th = _round_up(H, unit)
    if row_tile is not None:
        if row_tile <= 0 or row_tile % unit:
            raise ValueError(f"row_tile must be a positive multiple of {unit}")
        TH = row_tile
    else:
        cands = [t for t in range(unit, max_th + 1, unit)
                 if est_vmem(t) <= vmem_budget_bytes]
        if not cands:
            cands = [unit]
        divisors = [t for t in cands if H % t == 0]          # prefer zero padding waste
        TH = max(divisors) if divisors else max(cands)
        if N == 1 and TH >= H and max_th >= 2 * unit:
            # keep both v7x TensorCores busy: guarantee >= 2 grid points
            TH = unit * _cdiv(_cdiv(H, 2), unit)

    H_pad = _round_up(H, TH)
    n_tiles = H_pad // TH

    x_c = x_nchw.astype(cdt)
    if H_pad != H:
        # pad with zero rows at the bottom (consistent with "same" zero padding;
        # padded output rows are sliced off below) -- replaces the old
        # whole-image degenerate fallback.
        x_c = jnp.pad(x_c, ((0, 0), (0, 0), (0, H_pad - H), (0, 0)))
    # Free reshape: (H, W) flattened onto the lane axis; output is written
    # lane-dense straight into the NCHW buffer (no transposes, no pad pass).
    x_flat = x_c.reshape(N, Cin, H_pad * W)

    in_specs = [pl.BlockSpec((1, Cin, TH * W), lambda n, i: (n, 0, i))]
    operands = [x_flat]
    if ph > 0:
        tpb = TH // HALO                 # main tile measured in halo blocks
        n_hblocks = H_pad // HALO
        in_specs += [
            # halo block above the tile (clamped at the top; kernel zeroes it there)
            pl.BlockSpec((1, Cin, HALO * W),
                         lambda n, i: (n, 0, jnp.maximum(i * tpb - 1, 0))),
            # halo block below the tile (clamped at the bottom; kernel zeroes it there)
            pl.BlockSpec((1, Cin, HALO * W),
                         lambda n, i: (n, 0, jnp.minimum((i + 1) * tpb,
                                                         n_hblocks - 1))),
        ]
        operands += [x_flat, x_flat]
    in_specs += [w_spec, pl.BlockSpec((Cout, 1), lambda n, i: (0, 0))]
    operands += [w_arr, bias]

    kernel = partial(_convch_kernel, kh=kh, kw=kw, W=W,
                     fused=bool(fuse_taps), has_halo=ph > 0)

    out_flat = pl.pallas_call(
        kernel,
        out_shape=jax.ShapeDtypeStruct((N, Cout, H_pad * W), out_dtype),
        grid_spec=pltpu.PrefetchScalarGridSpec(
            num_scalar_prefetch=0,
            grid=(N, n_tiles),
            in_specs=in_specs,
            out_specs=pl.BlockSpec((1, Cout, TH * W), lambda n, i: (n, 0, i)),
        ),
        compiler_params=pltpu.CompilerParams(
            dimension_semantics=("parallel", "parallel"),
            vmem_limit_bytes=int(vmem_limit_bytes),
        ),
    )(*operands)

    out = out_flat.reshape(N, Cout, H_pad, W)
    if H_pad != H:
        out = out[:, :, :H, :]
    return out


def _reference(x, w_v, w_h, b_v, b_h):
    kh = w_v.shape[2]
    kw = w_h.shape[3]
    ph = (kh - 1) // 2
    pw = (kw - 1) // 2
    dn = ("NCHW", "OIHW", "NCHW")
    y_v = lax.conv_general_dilated(x, w_v, (1, 1), ((ph, ph), (0, 0)),
                                   dimension_numbers=dn)
    y_h = lax.conv_general_dilated(x, w_h, (1, 1), ((0, 0), (pw, pw)),
                                   dimension_numbers=dn)
    return (y_v + b_v[None, :, None, None]) + (y_h + b_h[None, :, None, None])


if __name__ == "__main__":
    # Small deterministic example: batch=2, in_ch=4, out_ch=8, 16x16, k=3.
    N, Cin, Cout, H, W, K_SZ = 2, 4, 8, 16, 16, 3

    key = jax.random.PRNGKey(0)
    kx, kwv, kwh, kbv, kbh = jax.random.split(key, 5)
    x = jax.random.normal(kx, (N, Cin, H, W), dtype=jnp.float32)
    w_v = jax.random.normal(kwv, (Cout, Cin, K_SZ, 1), dtype=jnp.float32) * 0.1
    w_h = jax.random.normal(kwh, (Cout, Cin, 1, K_SZ), dtype=jnp.float32) * 0.1
    b_v = jax.random.normal(kbv, (Cout,), dtype=jnp.float32) * 0.1
    b_h = jax.random.normal(kbh, (Cout,), dtype=jnp.float32) * 0.1

    ref = _reference(x, w_v, w_h, b_v, b_h)

    # 1) auto settings (fused im2col path, auto tile selection)
    out = jax.block_until_ready(conv2d_ch(x, w_v, w_h, b_v, b_h))
    assert out.shape == (N, Cout, H, W)
    assert jnp.allclose(out, ref, atol=1e-3, rtol=1e-3), "mismatch (auto / fused path)"

    # 2) multiple row tiles -> exercises the clamped-halo tiling path
    out_t = jax.block_until_ready(conv2d_ch(x, w_v, w_h, b_v, b_h, row_tile=8))
    assert jnp.allclose(out_t, ref, atol=1e-3, rtol=1e-3), "mismatch (multi-tile halo path)"

    # 3) per-tap accumulate path (the large-Cin formulation), forced at small Cin
    out_p = jax.block_until_ready(
        conv2d_ch(x, w_v, w_h, b_v, b_h, row_tile=8, fuse_taps=False))
    assert jnp.allclose(out_p, ref, atol=1e-3, rtol=1e-3), "mismatch (per-tap path)"

    # 4) bf16 compute path (bf16 I/O, fp32 accumulate) -- looser tolerance
    out_bf = jax.block_until_ready(
        conv2d_ch(x, w_v, w_h, b_v, b_h, compute_dtype=jnp.bfloat16))
    assert jnp.allclose(out_bf, ref, atol=5e-2, rtol=5e-2), "mismatch (bf16 path)"

    # 5) kh == 1 -> no vertical halo operands are DMA'd at all
    w_v1 = jax.random.normal(kwv, (Cout, Cin, 1, 1), dtype=jnp.float32) * 0.1
    ref1 = _reference(x, w_v1, w_h, b_v, b_h)
    out1 = jax.block_until_ready(conv2d_ch(x, w_v1, w_h, b_v, b_h))
    assert jnp.allclose(out1, ref1, atol=1e-3, rtol=1e-3), "mismatch (no-halo path)"

    print("KERNEL_OK")
</pallas_src>

<mosaic_0001>
module attributes {stable_mosaic.version = 11 : i64} {
  func.func @_convch_kernel(%arg0: i32, %arg1: i32, %arg2: memref<1x4x256xf32, #tpu.memory_space<vmem>>, %arg3: memref<1x4x128xf32, #tpu.memory_space<vmem>>, %arg4: memref<1x4x128xf32, #tpu.memory_space<vmem>>, %arg5: memref<8x24xf32, #tpu.memory_space<vmem>>, %arg6: memref<8x1xf32, #tpu.memory_space<vmem>>, %arg7: memref<1x8x256xf32, #tpu.memory_space<vmem>>) attributes {dimension_semantics = [#tpu.dimension_semantics<parallel>, #tpu.dimension_semantics<parallel>], iteration_bounds = array<i64: 2, 1>, scalar_prefetch = 0 : i64, scratch_operands = 0 : i64, tpu.core_type = #tpu.core_type<tc>, window_params = [{transform_indices = @transform_0, window_bounds = array<i64: 1, 4, 256>}, {transform_indices = @transform_1, window_bounds = array<i64: 1, 4, 128>}, {transform_indices = @transform_2, window_bounds = array<i64: 1, 4, 128>}, {pipeline_mode = #tpu.pipeline_mode<synchronous>, transform_indices = @transform_3, window_bounds = array<i64: 8, 24>}, {pipeline_mode = #tpu.pipeline_mode<synchronous>, transform_indices = @transform_4, window_bounds = array<i64: 8, 1>}, {transform_indices = @transform_5, window_bounds = array<i64: 1, 8, 256>}]} {
    %c0 = arith.constant 0 : index
    %c0_0 = arith.constant 0 : index
    %c0_1 = arith.constant 0 : index
    %0 = vector.load %arg2[%c0, %c0_0, %c0_1] : memref<1x4x256xf32, #tpu.memory_space<vmem>>, vector<1x4x256xf32>
    %1 = vector.shape_cast %0 : vector<1x4x256xf32> to vector<4x256xf32>
    %c0_2 = arith.constant 0 : index
    %c0_3 = arith.constant 0 : index
    %c112 = arith.constant 112 : index
    %2 = vector.load %arg3[%c0_2, %c0_3, %c112] : memref<1x4x128xf32, #tpu.memory_space<vmem>>, vector<1x4x16xf32>
    %3 = vector.shape_cast %2 : vector<1x4x16xf32> to vector<4x16xf32>
    %c0_4 = arith.constant 0 : index
    %c0_5 = arith.constant 0 : index
    %c0_6 = arith.constant 0 : index
    %4 = vector.load %arg4[%c0_4, %c0_5, %c0_6] : memref<1x4x128xf32, #tpu.memory_space<vmem>>, vector<1x4x16xf32>
    %5 = vector.shape_cast %4 : vector<1x4x16xf32> to vector<4x16xf32>
    %c0_i32 = arith.constant 0 : i32
    %6 = arith.cmpi eq, %arg1, %c0_i32 : i32
    %cst = arith.constant 0.000000e+00 : f32
    %7 = vector.broadcast %cst : f32 to vector<4x16xf32>
    %8 = arith.select %6, %7, %3 : vector<4x16xf32>
    %c0_i32_7 = arith.constant 0 : i32
    %9 = arith.cmpi eq, %arg1, %c0_i32_7 : i32
    %cst_8 = arith.constant 0.000000e+00 : f32
    %10 = vector.broadcast %cst_8 : f32 to vector<4x16xf32>
    %11 = arith.select %9, %10, %5 : vector<4x16xf32>
    %12 = tpu.concatenate %8, %1, %11 in 1 : vector<4x16xf32>, vector<4x256xf32>, vector<4x16xf32> -> vector<4x288xf32>
    %13 = tpu.iota {dimensions = array<i32: 1>} : vector<1x256xi32>
    %c16_i32 = arith.constant 16 : i32
    %c0_i32_9 = arith.constant 0 : i32
    %14 = arith.cmpi eq, %c16_i32, %c0_i32_9 : i32
    %c1_i32 = arith.constant 1 : i32
    %15 = arith.select %14, %c1_i32, %c16_i32 : i32
    %16 = vector.broadcast %15 : i32 to vector<1x256xi32>
    %17 = arith.remsi %13, %16 : vector<1x256xi32>
    %c0_i32_10 = arith.constant 0 : i32
    %18 = vector.broadcast %c0_i32_10 : i32 to vector<1x256xi32>
    %19 = arith.cmpi ne, %17, %18 : vector<1x256xi32>
    %c0_i32_11 = arith.constant 0 : i32
    %20 = vector.broadcast %c0_i32_11 : i32 to vector<1x256xi32>
    %21 = arith.cmpi slt, %17, %20 : vector<1x256xi32>
    %c0_i32_12 = arith.constant 0 : i32
    %22 = arith.cmpi slt, %15, %c0_i32_12 : i32
    %23 = vector.broadcast %22 : i1 to vector<1x256xi1>
    %24 = vector.broadcast %23 : vector<1x256xi1> to vector<1x256xi1>
    %25 = arith.xori %21, %24 : vector<1x256xi1>
    %26 = arith.andi %25, %19 : vector<1x256xi1>
    %27 = vector.broadcast %15 : i32 to vector<1x256xi32>
    %28 = arith.addi %17, %27 : vector<1x256xi32>
    %29 = arith.select %26, %28, %17 : vector<1x256xi1>, vector<1x256xi32>
    %cst_13 = arith.constant 0.000000e+00 : f32
    %30 = vector.broadcast %cst_13 : f32 to vector<4x256xf32>
    %31 = vector.extract_strided_slice %12 {offsets = [0, 0], sizes = [4, 256], strides = [1, 1]} : vector<4x288xf32> to vector<4x256xf32>
    %32 = vector.extract_strided_slice %12 {offsets = [0, 16], sizes = [4, 256], strides = [1, 1]} : vector<4x288xf32> to vector<4x256xf32>
    %33 = vector.extract_strided_slice %12 {offsets = [0, 32], sizes = [4, 256], strides = [1, 1]} : vector<4x288xf32> to vector<4x256xf32>
    %34 = vector.extract_strided_slice %1 {offsets = [0, 255], sizes = [4, 1], strides = [1, 1]} : vector<4x256xf32> to vector<4x1xf32>
    %35 = vector.extract_strided_slice %1 {offsets = [0, 0], sizes = [4, 255], strides = [1, 1]} : vector<4x256xf32> to vector<4x255xf32>
    %36 = tpu.concatenate %34, %35 in 1 : vector<4x1xf32>, vector<4x255xf32> -> vector<4x256xf32>
    %c-1_i32 = arith.constant -1 : i32
    %37 = vector.broadcast %c-1_i32 : i32 to vector<1x256xi32>
    %38 = arith.addi %29, %37 : vector<1x256xi32>
    %c0_i32_14 = arith.constant 0 : i32
    %39 = vector.broadcast %c0_i32_14 : i32 to vector<1x256xi32>
    %40 = arith.cmpi sge, %38, %39 : vector<1x256xi32>
    %c-1_i32_15 = arith.constant -1 : i32
    %41 = vector.broadcast %c-1_i32_15 : i32 to vector<1x256xi32>
    %42 = arith.addi %29, %41 : vector<1x256xi32>
    %c16_i32_16 = arith.constant 16 : i32
    %43 = vector.broadcast %c16_i32_16 : i32 to vector<1x256xi32>
    %44 = arith.cmpi slt, %42, %43 : vector<1x256xi32>
    %45 = arith.andi %40, %44 : vector<1x256xi1>
    %46 = vector.shape_cast %45 : vector<1x256xi1> to vector<1x256xi1>
    %47 = vector.broadcast %46 : vector<1x256xi1> to vector<4x256xi1>
    %48 = arith.select %47, %36, %30 : vector<4x256xi1>, vector<4x256xf32>
    %49 = vector.extract_strided_slice %1 {offsets = [0, 1], sizes = [4, 255], strides = [1, 1]} : vector<4x256xf32> to vector<4x255xf32>
    %50 = vector.extract_strided_slice %1 {offsets = [0, 0], sizes = [4, 1], strides = [1, 1]} : vector<4x256xf32> to vector<4x1xf32>
    %51 = tpu.concatenate %49, %50 in 1 : vector<4x255xf32>, vector<4x1xf32> -> vector<4x256xf32>
    %c1_i32_17 = arith.constant 1 : i32
    %52 = vector.broadcast %c1_i32_17 : i32 to vector<1x256xi32>
    %53 = arith.addi %29, %52 : vector<1x256xi32>
    %c0_i32_18 = arith.constant 0 : i32
    %54 = vector.broadcast %c0_i32_18 : i32 to vector<1x256xi32>
    %55 = arith.cmpi sge, %53, %54 : vector<1x256xi32>
    %c1_i32_19 = arith.constant 1 : i32
    %56 = vector.broadcast %c1_i32_19 : i32 to vector<1x256xi32>
    %57 = arith.addi %29, %56 : vector<1x256xi32>
    %c16_i32_20 = arith.constant 16 : i32
    %58 = vector.broadcast %c16_i32_20 : i32 to vector<1x256xi32>
    %59 = arith.cmpi slt, %57, %58 : vector<1x256xi32>
    %60 = arith.andi %55, %59 : vector<1x256xi1>
    %61 = vector.shape_cast %60 : vector<1x256xi1> to vector<1x256xi1>
    %62 = vector.broadcast %61 : vector<1x256xi1> to vector<4x256xi1>
    %63 = arith.select %62, %51, %30 : vector<4x256xi1>, vector<4x256xf32>
    %64 = tpu.concatenate %31, %32, %33, %48, %1, %63 in 0 : vector<4x256xf32>, vector<4x256xf32>, vector<4x256xf32>, vector<4x256xf32>, vector<4x256xf32>, vector<4x256xf32> -> vector<24x256xf32>
    %c0_21 = arith.constant 0 : index
    %c0_22 = arith.constant 0 : index
    %65 = vector.load %arg5[%c0_21, %c0_22] : memref<8x24xf32, #tpu.memory_space<vmem>>, vector<8x24xf32>
    %cst_23 = arith.constant dense<0.000000e+00> : vector<8x256xf32>
    %66 = tpu.matmul %65, %64, %cst_23 {dimension_numbers = #tpu.dot_dimension_numbers<[1], [0], [0], [1], [0, 0, 1, 1], [], []>} : vector<8x24xf32>, vector<24x256xf32>, vector<8x256xf32> -> vector<8x256xf32>
    %c0_24 = arith.constant 0 : index
    %c0_25 = arith.constant 0 : index
    %67 = vector.load %arg6[%c0_24, %c0_25] : memref<8x1xf32, #tpu.memory_space<vmem>>, vector<8x1xf32>
    %68 = vector.broadcast %67 : vector<8x1xf32> to vector<8x256xf32>
    %69 = arith.addf %66, %68 : vector<8x256xf32>
    %c0_26 = arith.constant 0 : index
    %c0_27 = arith.constant 0 : index
    %c0_28 = arith.constant 0 : index
    %70 = vector.load %arg7[%c0_26, %c0_27, %c0_28] : memref<1x8x256xf32, #tpu.memory_space<vmem>>, vector<1x8x256xf32>
    %71 = vector.shape_cast %70 : vector<1x8x256xf32> to vector<8x256xf32>
    %72 = vector.shape_cast %69 : vector<8x256xf32> to vector<1x8x256xf32>
    tpu.vector_store %arg7[%c0_26, %c0_27, %c0_28], %72 {strides = array<i32>} : memref<1x8x256xf32, #tpu.memory_space<vmem>>, vector<1x8x256xf32>,
    return
  }
  func.func @transform_0(%arg0: i32, %arg1: i32) -> (i32, i32, i32) {
    %c0_i32 = arith.constant 0 : i32
    %c0_i32_0 = arith.constant 0 : i32
    return %arg0, %c0_i32, %arg1 : i32, i32, i32
  }
  func.func @transform_1(%arg0: i32, %arg1: i32) -> (i32, i32, i32) {
    %c2_i32 = arith.constant 2 : i32
    %0 = arith.muli %arg1, %c2_i32 : i32
    %c1_i32 = arith.constant 1 : i32
    %1 = arith.subi %0, %c1_i32 : i32
    %c0_i32 = arith.constant 0 : i32
    %2 = arith.maxsi %1, %c0_i32 : i32
    %c0_i32_0 = arith.constant 0 : i32
    %c0_i32_1 = arith.constant 0 : i32
    return %arg0, %c0_i32_0, %2 : i32, i32, i32
  }
  func.func @transform_2(%arg0: i32, %arg1: i32) -> (i32, i32, i32) {
    %c1_i32 = arith.constant 1 : i32
    %0 = arith.addi %arg1, %c1_i32 : i32
    %c2_i32 = arith.constant 2 : i32
    %1 = arith.muli %0, %c2_i32 : i32
    %c1_i32_0 = arith.constant 1 : i32
    %2 = arith.minsi %1, %c1_i32_0 : i32
    %c0_i32 = arith.constant 0 : i32
    %c0_i32_1 = arith.constant 0 : i32
    return %arg0, %c0_i32, %2 : i32, i32, i32
  }
  func.func @transform_3(%arg0: i32, %arg1: i32) -> (i32, i32) {
    %c0_i32 = arith.constant 0 : i32
    %c0_i32_0 = arith.constant 0 : i32
    %c0_i32_1 = arith.constant 0 : i32
    return %c0_i32, %c0_i32_0 : i32, i32
  }
  func.func @transform_4(%arg0: i32, %arg1: i32) -> (i32, i32) {
    %c0_i32 = arith.constant 0 : i32
    %c0_i32_0 = arith.constant 0 : i32
    %c0_i32_1 = arith.constant 0 : i32
    return %c0_i32, %c0_i32_0 : i32, i32
  }
  func.func @transform_5(%arg0: i32, %arg1: i32) -> (i32, i32, i32) {
    %c0_i32 = arith.constant 0 : i32
    %c0_i32_0 = arith.constant 0 : i32
    return %arg0, %c0_i32, %arg1 : i32, i32, i32
  }
}

</mosaic_0001>

<bundles_post_ra>
// kernel: tpu_custom_call.1
= control target key start
LH: loop header
LB: loop body
LE: loop exit
PB: predicated region body
PF: predicated region fallthrough
CT: control target
= control target key end

     0   :  { %s1290_s0 = inlined_call_operand.hbm [shape: f32[2,4,256], index: 0, kind: input, shape index: {}]   ;;  %s1291_s1 = inlined_call_operand.hbm [shape: f32[2,4,256], index: 1, kind: input, shape index: {}]   ;;  %s1292_s2 = inlined_call_operand.hbm [shape: f32[2,4,256], index: 2, kind: input, shape index: {}]   ;;  %s1293_s3 = inlined_call_operand.vmem [shape: f32[8,24], index: 3, kind: input, shape index: {}]   ;;  %s1294_s4 = inlined_call_operand.vmem [shape: f32[8,1], index: 4, kind: input, shape index: {}]   ;;  %s1295_s5 = inlined_call_operand.hbm [shape: f32[2,8,256], index: 5, kind: output, shape index: {}]  }
   0x1   :  { %1302 = sst [smem:[#allocation17_spill]] %s1291_s1 }
   0x2   :  { %10 = vsyncpa [#allocation3], 0 }
   0x3   :  { %12 = vsyncpa [#allocation3 + $0x1], 0 }
   0x4   :  { %13 = vsyncpa [#allocation6], 0 }
   0x5   :  { %15 = vsyncpa [#allocation6 + $0x1], 0 }
   0x6   :  { %16 = vsyncpa [#allocation4], 0 }
   0x7   :  { %18 = vsyncpa [#allocation4 + $0x1], 0  ;;  %s1084_s18 = smov 0   ;;  %s1086_s19 = smov 0  }
   0x8   :  { %s1088_s20 = smov 0   ;;  %s1090_s21 = smov 0  }
   0x9   :  { %s1092_s22 = smov 0   ;;  %s1094_s23 = smov 0  }
   0xa LB: > { %1303 = sst [smem:[#allocation12_spill]] %s1029_s20  ;;  %s1115_s24 = sadd.s32 4294967295, %s1041_s23   ;;  %s1041_s23 = sphi %s1094_s23, %s24_s23   ;;  %s1037_s22 = sphi %s1092_s22, %s1321_s22   ;;  %s1033_s21 = sphi %s1090_s21, %s1320_s21   ;;  %s1029_s20 = sphi %s1088_s20, %s1319_s20   ;;  %s1025_s19 = sphi %s1086_s19, %s1323_s19   ;;  %s1021_s18 = sphi %s1084_s18, %s1322_s18  }
   0xb   : > { %1304 = sst [smem:[#allocation13_spill]] %s1037_s22  ;;  %s757_s25 = sadd.s32 4294967294, %s1041_s23  }
   0xc   : > { %1305 = sst [smem:[#allocation14_spill]] %s1041_s23  ;;  %s36_s26 = sadd.s32 1, %s1037_s22 }
   0xd   : > { %s45_s27 = sadd.s32 1, %s1029_s20  ;;  %p38_p0 = scmp.ge.s32.totalorder %s36_s26, 2 }
   0xe   : > { %p52_p1 = scmp.ne.s32.totalorder %s1029_s20, %s1025_s19  ;;  %p53_p2 = scmp.eq.s32.totalorder %s1041_s23, 0 }
   0xf   : > { %p58_p3 = scmp.ne.s32.totalorder %s1025_s19, %s1021_s18  ;;  %s1325_s26 = smov (%p38_p0, %s36_s26), 0 }
  0x10   : > { %1306 = sst [smem:[#allocation15_spill]] %s1325_s26  ;;  %p1127_p4 = por %p53_p2, %p52_p1 }
  0x11   : > { %p59_p5 = scmp.eq.s32.totalorder %s1115_s24, 0  ;;  %s40_s29 = ssub.s32 %s1037_s22, %s1325_s26 }
  0x12   : > { %p198_p6 = scmp.eq.s32.totalorder %s1115_s24, 1  ;;  %p43_p7 = scmp.eq.s32.totalorder %s40_s29, 0 }
  0x13   : > { %p1135_p8 = por %p59_p5, %p58_p3  ;;  %p204_p10 = scmp.eq.s32.totalorder %s757_s25, 1 }
  0x14   : > { %p1139_p9 = por %p198_p6, %p52_p1  ;;  %p808_p13 = scmp.lt.s32.totalorder %s1041_s23, 2 }
  0x15   : > { %s1144_s7 = scalar_select %p43_p7, %s1029_s20, %s45_s27  }
  0x16   : > { %p1146_p11 = por %p204_p10, %p58_p3  ;;  %s1153_s9 = sand.u32 1, %s1029_s20  }
  0x17   : > { %1310 = sst [smem:[#allocation16_spill]] %s1144_s7  ;;  %s1156_s10 = sshll.u32 %s1037_s22, 7 }
  0x18   : > { %s251_s11 = sand.u32 1, %s1041_s23   ;;  %p1161_p0 = pnand %p808_p13, %p1127_p4 }
  0x19   : > { %s1297_s13 = sshll.u32 %s1153_s9, 2  ;;  %s1313_s1 = sld [smem:[#allocation17_spill]] }
  0x1a   : > { %s255_s17 = scalar_lea.vmem [#allocation5], %s1297_s13  ;;  %p769_p1 = scmp.ge.s32.totalorder %s1041_s23, 1 }
  0x1b   : > { %s268_s25 = sshll.u32 %s255_s17, 4  ;;  %s1173_s27 = scalar_lea.sflag [#allocation6], %s251_s11  ;;  %s269_s25 = int_to_ptr.vmem [resolvable:$true] %s268_s25 }
  0x1c   : > { %p875_p2 = pneg %p1161_p0  ;;  %s886_s28 = scalar_lea.vmem %s269_s25, 64 }
  0x1d   : > { %p887_p3 = scmp.ne.s32.totalorder %s269_s25, %s886_s28  ;;  %s1043_s29 = smov [#allocation5]  }
  0x1e   : > { %s891_s26 = sshll.u32 %s1043_s29, 4  ;;  %s892_s26 = int_to_ptr.vmem [resolvable:$false] %s891_s26 }
  0x1f   : > { %s266_s16 = scalar_lea.hbm %s1313_s1, %s1156_s10  ;;  %p889_p4 = pnand %p887_p3, %p875_p2 }
  0x20   : > { %s893_s14 = scalar_lea.vmem %s892_s26, 128  ;;  %p894_p6 = scmp.lt.s32.totalorder %s269_s25, %s892_s26 }
  0x21   : > { %p890_p5 = pneg %p889_p4  ;;  %p895_p7 = scmp.lt.s32.totalorder %s893_s14, %s886_s28 }
  0x23   : > { %p896_p10 = por %p895_p7, %p894_p6 }
  0x25   : > { %p897_p13 = pnand %p896_p10, %p890_p5 }
  0x27   : > { %900 = shalt.err (!%p897_p13)
}
  0x28   : > { %800 = dma.hbm_to_vmem [thread:$0]  (!%p1161_p0), %s266_s16, 64, %s269_s25, %s1173_s27  }
  0x29   : > { %p297_p3 = scmp.lt.s32.totalorder %s1041_s23, 3  ;;  %s760_s26 = sshll.u32 %s1153_s9, 3 }
  0x2a   : > { %s242_s28 = scalar_lea.hbm %s1290_s0, %s1156_s10  ;;  %s234_s29 = scalar_lea.vmem [#allocation2], %s760_s26 }
  0x2b   : > { %p1186_p4 = pnand %p769_p1, %p297_p3  ;;  %s244_s14 = sshll.u32 %s234_s29, 4  ;;  %s245_s14 = int_to_ptr.vmem [resolvable:$true] %s244_s14 }
  0x2c   : > { %s783_s13 = sadd.s32 64, %s1156_s10  ;;  %s231_s16 = scalar_lea.sflag [#allocation3], %s1153_s9 }
  0x2d   : > { %s1199_s7 = scalar_lea.hbm %s1292_s2, %s783_s13  ;;  %s914_s25 = scalar_lea.vmem %s245_s14, 128 }
  0x2e   : > { %p915_p1 = scmp.ne.s32.totalorder %s245_s14, %s914_s25  ;;  %s1044_s20 = smov [#allocation2]  }
  0x2f   : > { %s919_s23 = sshll.u32 %s1044_s20, 4  ;;  %s920_s23 = int_to_ptr.vmem [resolvable:$false] %s919_s23 }
  0x30   : > { %p917_p5 = pnand %p915_p1, %p875_p2  ;;  %s921_s15 = scalar_lea.vmem %s920_s23, 256 }
  0x31   : > { %p922_p7 = scmp.lt.s32.totalorder %s245_s14, %s920_s23  ;;  %p923_p10 = scmp.lt.s32.totalorder %s921_s15, %s914_s25 }
  0x32   : > { %p918_p6 = pneg %p917_p5 }
  0x33   : > { %p924_p13 = por %p923_p10, %p922_p7 }
  0x35   : > { %p925_p3 = pnand %p924_p13, %p918_p6 }
  0x37   : > { %928 = shalt.err (!%p925_p3)
}
  0x38   : > { %797 = dma.hbm_to_vmem [thread:$0]  (!%p1161_p0), %s242_s28, 128, %s245_s14, %s231_s16  }
  0x39   : > { %s1315_s1 = sshll.u32 %s1153_s9, 2  ;;  %s1045_s20 = smov [#allocation7]  }
  0x3a   : > { %s279_s22 = scalar_lea.vmem [#allocation7], %s1315_s1  ;;  %s947_s23 = sshll.u32 %s1045_s20, 4  ;;  %s948_s23 = int_to_ptr.vmem [resolvable:$false] %s947_s23 }
  0x3b   : > { %s292_s10 = sshll.u32 %s279_s22, 4  ;;  %s949_s26 = scalar_lea.vmem %s948_s23, 128  ;;  %s293_s10 = int_to_ptr.vmem [resolvable:$true] %s292_s10 }
  0x3c   : > { %s942_s13 = scalar_lea.vmem %s293_s10, 64  ;;  %p950_p6 = scmp.lt.s32.totalorder %s293_s10, %s948_s23 }
  0x3d   : > { %p943_p1 = scmp.ne.s32.totalorder %s293_s10, %s942_s13  ;;  %p951_p7 = scmp.lt.s32.totalorder %s949_s26, %s942_s13 }
  0x3f   : > { %p945_p5 = pnand %p943_p1, %p875_p2  ;;  %p952_p10 = por %p951_p7, %p950_p6 }
  0x41   : > { %p946_p12 = pneg %p945_p5 }
  0x43   : > { %p953_p13 = pnand %p952_p10, %p946_p12 }
  0x45   : > { %956 = shalt.err (!%p953_p13)
}
  0x46   : > { %803 = dma.hbm_to_vmem [thread:$0]  (!%p1161_p0), %s1199_s7, 64, %s293_s10, %s1173_s27  }
  0x47   : > { %301 = sbr.rel (%p1186_p4) target bundleno = 538 (0x21a), region = 40  ;;  %s1219_s9 = sand.u32 (!%p1186_p4), 1, %s1025_s19  }
  0x48   : > { %s770_s17 = sshll.u32 (!%p1186_p4), %s1219_s9, 3  ;;  %s304_s28 = scalar_lea.sflag (!%p1186_p4), [#allocation3], %s1219_s9 }
  0x49   : > { %s307_s29 = scalar_lea.vmem (!%p1186_p4), [#allocation2], %s770_s17 }
  0x4c   : > { %1008 = dma.done.wait (%p1135_p8), %s304_s28, 128  }
  0x4d   : > { %1010 = vsyncadd (%p1135_p8), %s304_s28, 4294967168  ;;  %s312_s7 = sand.u32 1, %s1115_s24  }
  0x4e   : > { %s313_s12 = scalar_lea.sflag [#allocation6], %s312_s7 }
  0x4f   : > { %1012 = dma.done.wait (%p1135_p8), %s313_s12, 128  }
  0x50   : > { %1014 = vsyncadd (%p1135_p8), %s313_s12, 4294967168  ;;  %v1046_v0 = vmov 0.0   ;;  %s1047_s27 = smov 16   ;;  %v372_v1 = vld [vmem:[%s307_s29] sm:$0xff]  ;;  %s1048_s11 = smov 127   ;;  %v402_v3 = vlaneseq  ;;  %vm391_vm0 = vcmask 130048  }
  0x51   : > { %599 = vmatprep.mubr.f32.mxu0 %v1046_v0  ;;  %866 = vrot.lane.b32.xlu1 %v1046_v0, %s1047_s27  ;;  %v386_v2 = vcombine.high %v372_v1, %v372_v1  ;;  %s1049_s14 = smov 1   ;;  %s1050_s24 = smov 96   ;;  %v1051_v18 = vmov 0   ;;  %vm457_vm1 = vcmask 1039360   ;;  %vm517_vm4 = vcmask 1043456   ;;  %v525_v30 = vld [vmem:[%s1294_s4] sm:$0xff] }
  0x52   : > { %387 = vrot.lane.b32.xlu0 %v372_v1, %s1047_s27  ;;  %v403_v4 = vand.u32 127, %v402_v3  ;;  %870 = vset.pattern.permute.xlu1 %v1051_v18  ;;  %s1052_s30 = smov 112   ;;  %vm434_vm5 = vcmask 7168   ;;  %vm499_vm8 = vcmask 785408   ;;  %vm488_vm9 = vcmask 916480   ;;  %v524_v56 = vld [vmem:[%s1293_s3] sm:$0xff] }
  0x53   : > { %871 = vset.pattern.permute.xlu0 %v1051_v18  ;;  %vm531_vm10 = vcmask 195584   ;;  %s773_s22 = sshll.u32 %s1219_s9, 4  ;;  %s784_s10 = sshll.u32 %s1033_s21, 8 }
  0x54   : > { %v404_v6 = vadd.s32 128, %v403_v4  ;;  %v409_v8 = vand.u32 15, %v403_v4  ;;  %s361_s13 = scalar_lea.vmem [#allocation8], %s773_s22  ;;  %s623_s17 = scalar_lea.hbm %s1295_s5, %s784_s10 }
  0x55   : > { %453 = vrot.lane.b32.xlu1 %v372_v1, %s1048_s11  ;;  %s625_s20 = sshll.u32 %s361_s13, 4  ;;  %s609_s28 = scalar_lea.sflag [#allocation4], %s1219_s9  ;;  %s626_s20 = int_to_ptr.vmem [resolvable:$true] %s625_s20 }
  0x56   : > { %389 = vrot.lane.b32.xlu0 %v386_v2, %s1047_s27  ;;  %v416_v9 = vand.u32 15, %v404_v6  ;;  %v463_v13 = vadd.s32 1, %v409_v8  ;;  %v439_v34 = vadd.s32 4294967295, %v409_v8  ;;  %s957_s29 = scalar_lea.vmem %s626_s20, 256  ;;  %s1053_s7 = smov [#allocation8]  }
  0x57   : > { %p958_p8 = scmp.ne.s32.totalorder %s626_s20, %s957_s29  ;;  %s961_s21 = sshll.u32 %s1053_s7, 4  ;;  %s962_s21 = int_to_ptr.vmem [resolvable:$false] %s961_s21 }
  0x58   : > { %v464_v14 = vadd.s32 1, %v416_v9  ;;  %vm467_vm2 = vcmp.lt.s32.totalorder %v463_v13, 16  ;;  %v440_v35 = vadd.s32 4294967295, %v416_v9  ;;  %vm441_vm6 = vcmp.ge.s32.totalorder %v439_v34, 0  ;;  %s963_s12 = scalar_lea.vmem %s962_s21, 512  ;;  %p964_p2 = scmp.lt.s32.totalorder %s626_s20, %s962_s21 }
  0x59   : > { %429 = vrot.lane.b32.xlu1 %v386_v2, %s1049_s14  ;;  %p959_p12 = pnand %p958_p8, %p1139_p9  ;;  %p965_p4 = scmp.lt.s32.totalorder %s963_s12, %s957_s29 }
  0x5a   : > { %455 = vrot.lane.b32.xlu0 %v386_v2, %s1048_s11  ;;  %vm468_vm3 = vcmp.lt.s32.totalorder %v464_v14, 16  ;;  %vm442_vm7 = vcmp.ge.s32.totalorder %v440_v35, 0 }
  0x5b   : > { %p960_p0 = pneg %p959_p12  ;;  %p966_p3 = por %p965_p4, %p964_p2 }
  0x5d   : > { %p967_p1 = pnand %p966_p3, %p960_p0 }
  0x5e   : > { %432 = vrot.lane.b32.xlu0 %v372_v1, %s1049_s14 }
  0xc3   : > { %v867_v5 = vpop.permute.xlu1 %866 }
  0xc4   : > { %v869_v7 = vunpack.i.h.bf16 %v867_v5  ;;  %v388_v10 = vpop.permute.xlu0 %387  ;;  %v868_v11 = vunpack.i.l.bf16 %v867_v5 }
  0xc6   : > { %v1232_v12 = vsel %vm391_vm0, %v869_v7, %v388_v10 }
  0xc7   : > { %493 = vrot.lane.b32.xlu1 %v1232_v12, %s1050_s24  ;;  %v454_v21 = vpop.permute.xlu1 %453  ;;  %v479_v29 = vrot.slane %v1232_v12, 4 }
  0xc8   : > { %v390_v15 = vpop.permute.xlu0 %389 }
  0xc9   : > { %v401_v16 = vsel %vm391_vm0, %v390_v15, %v868_v11  ;;  %v392_v17 = vsel %vm391_vm0, %v388_v10, %v390_v15 }
  0xca   : > { %497 = vrot.lane.b32.xlu0 %v401_v16, %s1050_s24  ;;  %v481_v19 = vrot.slane %v401_v16, 4  ;;  %v480_v20 = vrot.slane %v392_v17, 4 }
  0xcb   : > { %495 = vrot.lane.b32.xlu1 %v392_v17, %s1050_s24  ;;  %v430_v33 = vpop.permute.xlu1 %429 }
  0xcc   : > { %v456_v22 = vpop.permute.xlu0 %455 }
  0xcd   : > { %v458_v23 = vsel %vm457_vm1, %v454_v21, %v456_v22  ;;  %v462_v24 = vsel %vm457_vm1, %v456_v22, %v454_v21 }
  0xce   : > { %484 = vrot.lane.b32.xlu0 %v480_v20, %s1052_s30  ;;  %v475_v25 = vsel %vm467_vm2, %v458_v23, 0.0  ;;  %v476_v26 = vsel %vm468_vm3, %v462_v24, 0.0 }
  0xcf   : > { %486 = vrot.lane.b32.xlu1 %v481_v19, %s1052_s30  ;;  %v513_v27 = vrot.slane %v475_v25, 4  ;;  %v514_v28 = vrot.slane %v476_v26, 4 }
  0xd0   : > { %v433_v36 = vpop.permute.xlu0 %432 }
  0xd1   : > { %v523_v31 = vsel %vm517_vm4, %v386_v2, %v514_v28  ;;  %v522_v32 = vsel %vm517_vm4, %v372_v1, %v513_v27  ;;  %v435_v37 = vsel %vm434_vm5, %v433_v36, %v430_v33  ;;  %v438_v38 = vsel %vm434_vm5, %v430_v33, %v433_v36 }
  0xd2   : > { %482 = vrot.lane.b32.xlu0 %v479_v29, %s1052_s30  ;;  %561 = vmatprep.subr.mxu0 %v523_v31  ;;  %v451_v40 = vsel %vm441_vm6, %v438_v38, 0.0  ;;  %v452_v41 = vsel %vm442_vm7, %v435_v37, 0.0 }
  0xd3   : > { %562 = vmatpush1.msra.mxu0 %v522_v32  ;;  %528 = vperm.xlu1 %870, %v525_v30   ;;  %v506_v42 = vrot.slane %v451_v40, 4  ;;  %v507_v43 = vrot.slane %v452_v41, 4 }
 0x139   : > { %v494_v39 = vpop.permute.xlu1 %493 }
 0x13c   : > { %v498_v45 = vpop.permute.xlu0 %497 }
 0x13d   : > { %v496_v44 = vpop.permute.xlu1 %495 }
 0x13e   : > { %v500_v46 = vsel %vm499_vm8, %v494_v39, %v496_v44  ;;  %v501_v47 = vsel %vm499_vm8, %v496_v44, %v498_v45 }
 0x13f   : > { %v521_v48 = vsel %vm517_vm4, %v501_v47, %v507_v43  ;;  %v520_v49 = vsel %vm517_vm4, %v500_v46, %v506_v42 }
 0x140   : > { %563 = vmatprep.subr.mxu0 %v521_v48  ;;  %v485_v51 = vpop.permute.xlu0 %484 }
 0x141   : > { %v487_v50 = vpop.permute.xlu1 %486  ;;  %564 = vmatpush1.msra.mxu0 %v520_v49 }
 0x142   : > { %v490_v52 = vsel %vm488_vm9, %v485_v51, %v487_v50 }
 0x143   : > { %v519_v53 = vsel %vm517_vm4, %v392_v17, %v490_v52 }
 0x144   : > { %565 = vmatprep.subr.mxu0 %v519_v53  ;;  %v483_v54 = vpop.permute.xlu0 %482 }
 0x145   : > { %v489_v55 = vsel %vm488_vm9, %v483_v54, %v485_v51 }
 0x146   : > { %v518_v57 = vsel %vm517_vm4, %v1232_v12, %v489_v55 }
 0x147   : > { %566 = vmatpush1.msra.mxu0 %v518_v57 }
 0x148   : > { %774 = vmatmul.mubr.msk.f32.vlgmr.msra.gmra.mxu0 %vm531_vm10, %v524_v56 }
 0x14e   : > { %v529_v58 = vpop.permute.xlu1 %528 }
 0x208   : > { %v601_v59 = vpop.f32.mrf.mxu0 }
 0x209   : > { %v602_v60 = vadd.f32 %v601_v59, %v529_v58 }
 0x20a   : > { %v603_v61 = vpop.f32.mrf.mxu0 }
 0x20b   : > { %606 = vst [vmem:[%s361_s13] sm:$0xff] %v602_v60  ;;  %v604_v62 = vadd.f32 %v603_v61, %v529_v58 }
 0x20d   : > { %607 = vst [vmem:[%s361_s13 + $0x8] sm:$0xff] %v604_v62 }
 0x20e   : > { %970 = shalt.err (!%p967_p1)
}
 0x20f   : > { %s971_s27 = scalar_lea.hbm %s623_s17, 256  ;;  %s975_s14 = scalar_lea.hbm %s1295_s5, 512 }
 0x210   : > { %p972_p5 = scmp.ne.s32.totalorder %s623_s17, %s971_s27  ;;  %p976_p10 = scmp.lt.s32.totalorder %s623_s17, %s1295_s5 }
 0x211   : > { %p977_p13 = scmp.lt.s32.totalorder %s975_s14, %s971_s27 }
 0x212   : > { %p973_p6 = pnand %p972_p5, %p1139_p9 }
 0x213   : > { %p978_p8 = por %p977_p13, %p976_p10 }
 0x214   : > { %p974_p7 = pneg %p973_p6 }
 0x216   : > { %p979_p12 = pnand %p978_p8, %p974_p7 }
 0x218   : > { %982 = shalt.err (!%p979_p12)
}
 0x219   : > { %792 = dma.vmem_to_hbm [thread:$0]  (%p1139_p9), %s626_s20, 256, %s623_s17, %s609_s28  }
 0x21a PF: > { %s1316_s16 = sld [smem:[#allocation14_spill]]  ;;  %s637_s25 = sand.u32 1, %s1021_s18  }
 0x21b   : > { %s638_s15 = scalar_lea.sflag [#allocation4], %s637_s25 }
 0x220   : > { %p1317_p0 = scmp.ge.s32.totalorder %s1316_s16, 2 }
 0x222   : > { %p805_p2 = pnand %p1317_p0, %p1146_p11 }
 0x224   : > { %p806_p4 = pneg %p805_p2 }
 0x226   : > { %1016 = dma.done.wait (%p806_p4), %s638_s15, 256  }
 0x227   : > { %1018 = vsyncadd (%p806_p4), %s638_s15, 4294967040  ;;  %s24_s23 = sadd.s32 1, %s1316_s16   ;;  %s1318_s1 = sld [smem:[#allocation12_spill]] }
 0x228   : > { %p21_p3 = scmp.ge.s32.totalorder %s24_s23, 4   ;;  %s1319_s20 = sld [smem:[#allocation16_spill]] }
 0x229   : > { %s1320_s21 = sld [smem:[#allocation13_spill]]  ;;  %s1322_s18 = smov %s1025_s19 }
 0x22a   : > { %s1321_s22 = sld [smem:[#allocation15_spill]]  ;;  %23 = sbr.rel (!%p21_p3) target bundleno = 10 (0xa), region = 109 }
 0x22d   : > { %s1323_s19 = smov %s1318_s1 }
 0x22f   :  { %643 = vsyncpa [#allocation3], 1 }
 0x230   :  { %645 = vsyncpa [#allocation3 + $0x1], 1 }
 0x231   :  { %646 = vsyncpa [#allocation6], 1 }
 0x232   :  { %648 = vsyncpa [#allocation6 + $0x1], 1 }
 0x233   :  { %649 = vsyncpa [#allocation4], 1 }
 0x234   :  { %651 = vsyncpa [#allocation4 + $0x1], 1 }

</bundles_post_ra>
